<compile_context>
chip_gen: v7x
topology: tpu7x:2x2x1
jax: 0.10.0
libtpu: 0.0.40
codegen_flags: <defaults>
</compile_context>

<pallas_src>
import functools
import math

import jax
import jax.numpy as jnp
from jax import lax
from jax.experimental import pallas as pl
from jax.experimental.pallas import tpu as pltpu


def _gelu_exact(x):
    # Exact (erf-based) GELU == torch.nn.GELU() default (approximate='none').
    # If profiling shows the VPU erf polynomial binding while the MXU idles
    # (tiny D), switch to the tanh approximation (lands on the EUP slot).
    return 0.5 * x * (1.0 + lax.erf(x * 0.7071067811865476))


def _mlp_kernel(x_ref, w1_ref, b1_ref, w2_ref, b2_ref, g_ref, beta_ref, o_ref,
                *, eps):
    """One (tm, D) row tile: LayerNorm -> fc1 -> GELU -> fc2."""
    # ---- LayerNorm in f32 over the lane-dense last dim (biased variance) ----
    x = x_ref[...].astype(jnp.float32)
    mean = jnp.mean(x, axis=-1, keepdims=True)
    xc = x - mean
    var = jnp.mean(xc * xc, axis=-1, keepdims=True)
    xn = xc * lax.rsqrt(var + eps)
    xn = xn * g_ref[...] + beta_ref[...]          # gamma/beta already f32

    # ---- fc1 + GELU: operands in the resident weight dtype (no per-step
    #      weight upcasts), single MXU pass, f32 accumulation ----
    h = jnp.dot(xn.astype(w1_ref.dtype), w1_ref[...],
                preferred_element_type=jnp.float32)
    h = _gelu_exact(h + b1_ref[...])

    # ---- fc2 ----
    y = jnp.dot(h.astype(w2_ref.dtype), w2_ref[...],
                preferred_element_type=jnp.float32)
    o_ref[...] = (y + b2_ref[...]).astype(o_ref.dtype)


def _round_up(n, m):
    return -(-n // m) * m


def _pick_row_tile(M):
    """MXU-aligned row tile for a cdiv grid (partial last block is fine).

    Goals: amortize the ~600-cycle per-step overhead, keep the matmul M-dim
    MXU-shaped (multiple of 256 when M is large), and keep >= 2 grid steps for
    small M so the "parallel" axis can shard across v7x's two TensorCores.
    """
    if M <= 8:
        return M                      # full-extent block (always legal)
    if M >= 1024:
        return 512
    if M >= 512:
        return 256
    half = -(-M // 2)                 # split small M across two cores
    return min(M, _round_up(half, 8))  # keep sublanes a multiple of 8


def _vmem_limit_bytes(tm, D, x_itemsize, w_itemsize):
    tiles = 2 * 2 * tm * D * x_itemsize    # x + out row tiles, double buffered
    weights = 2 * 2 * D * D * w_itemsize   # W1^T + W2^T (worst case 2 buffers)
    params = 2 * 4 * D * 4                 # b1, b2, gamma, beta in f32
    temps = 4 * tm * D * 4                 # in-kernel f32 intermediates
    need = int(1.5 * (tiles + weights + params + temps))
    return int(min(128 << 20, max(32 << 20, need)))


def element_wise_mlp(x, w1, b1, w2, b2, gamma, beta, *, eps=1e-5):
    """Pallas TPU ElementWiseMLP forward.

    w1, w2: PyTorch nn.Linear weights, shape (out_features, in_features).
    Matmul operands run in x.dtype with f32 accumulation; pass bf16 x / weights
    for maximum MXU throughput and halved weight residency.
    """
    orig_shape = x.shape
    D = orig_shape[-1]
    M = math.prod(orig_shape[:-1])
    x2 = x.reshape(M, D)

    # One-time layout / dtype prep in the wrapper:
    #  * transpose weights so the kernel does plain row-major x @ W^T (output
    #    features on lanes) and cast them ONCE to the matmul operand dtype,
    #  * biases / LN affine params pre-cast to f32 (1, D).
    w_dtype = x.dtype
    w1t = jnp.asarray(w1).T.astype(w_dtype).reshape(D, D)
    w2t = jnp.asarray(w2).T.astype(w_dtype).reshape(D, D)
    b1r = jnp.asarray(b1).astype(jnp.float32).reshape(1, D)
    b2r = jnp.asarray(b2).astype(jnp.float32).reshape(1, D)
    gr = jnp.asarray(gamma).astype(jnp.float32).reshape(1, D)
    br = jnp.asarray(beta).astype(jnp.float32).reshape(1, D)

    tm = _pick_row_tile(M)
    grid = (pl.cdiv(M, tm),)   # partial last block: rows are independent, OOB
                               # rows are discarded on write

    kernel = functools.partial(_mlp_kernel, eps=eps)

    x_isize = jnp.dtype(x.dtype).itemsize
    w_isize = jnp.dtype(w_dtype).itemsize
    cost = pl.CostEstimate(
        flops=4 * M * D * D,             # two (M,D)x(D,D) matmuls
        transcendentals=M * D,           # erf in GELU
        bytes_accessed=2 * M * D * x_isize + 2 * D * D * w_isize + 4 * D * 4,
    )

    rep = lambda i: (0, 0)  # weights / params stay resident across row tiles
    # TODO(synk): single-buffer the six constant-index_map param specs
    # (pipeline_mode=pl.Buffered(1)) and add a hidden-dim "arbitrary" grid axis
    # with a VMEM f32 accumulator once the 2*D^2 resident weights no longer fit
    # the v7x 64 MiB VMEM budget (D >~ 2k in bf16).

    out = pl.pallas_call(
        kernel,
        out_shape=jax.ShapeDtypeStruct((M, D), x.dtype),
        grid=grid,
        in_specs=[
            pl.BlockSpec((tm, D), lambda i: (i, 0)),  # x row tile
            pl.BlockSpec((D, D), rep),                # W1^T (resident)
            pl.BlockSpec((1, D), rep),                # b1   (f32)
            pl.BlockSpec((D, D), rep),                # W2^T (resident)
            pl.BlockSpec((1, D), rep),                # b2   (f32)
            pl.BlockSpec((1, D), rep),                # LN gamma (f32)
            pl.BlockSpec((1, D), rep),                # LN beta  (f32)
        ],
        out_specs=pl.BlockSpec((tm, D), lambda i: (i, 0)),
        compiler_params=pltpu.CompilerParams(
            dimension_semantics=("parallel",),
            vmem_limit_bytes=_vmem_limit_bytes(tm, D, x_isize, w_isize)),
        cost_estimate=cost,
    )(x2, w1t, b1r, w2t, b2r, gr, br)

    return out.reshape(orig_shape)


def _reference(x, w1, b1, w2, b2, gamma, beta, eps=1e-5):
    # Pure-JAX mirror of the PyTorch forward (biased-variance LayerNorm,
    # exact erf GELU).  Uses default matmul precision so it exercises the same
    # single-pass MXU path as the kernel.
    mean = jnp.mean(x, axis=-1, keepdims=True)
    var = jnp.mean((x - mean) ** 2, axis=-1, keepdims=True)
    xn = (x - mean) * lax.rsqrt(var + eps) * gamma + beta
    h = jnp.dot(xn, w1.T, preferred_element_type=jnp.float32) + b1
    h = 0.5 * h * (1.0 + lax.erf(h * 0.7071067811865476))
    y = jnp.dot(h, w2.T, preferred_element_type=jnp.float32) + b2
    return y


if __name__ == "__main__":
    key = jax.random.PRNGKey(0)
    B, S, D = 2, 8, 32  # batch=2, seq=8, dim=32
    ks = jax.random.split(key, 5)

    x = jax.random.normal(ks[0], (B, S, D), dtype=jnp.float32)
    bound = 1.0 / math.sqrt(D)
    w1 = jax.random.uniform(ks[1], (D, D), jnp.float32, -bound, bound)
    b1 = jax.random.uniform(ks[2], (D,), jnp.float32, -bound, bound)
    w2 = jax.random.uniform(ks[3], (D, D), jnp.float32, -bound, bound)
    b2 = jax.random.uniform(ks[4], (D,), jnp.float32, -bound, bound)
    gamma = jnp.ones((D,), jnp.float32)   # nn.LayerNorm default init
    beta = jnp.zeros((D,), jnp.float32)

    out = element_wise_mlp(x, w1, b1, w2, b2, gamma, beta)
    out = jax.block_until_ready(out)

    ref = _reference(x, w1, b1, w2, b2, gamma, beta)
    assert out.shape == ref.shape
    # Tolerance accounts for default (single bf16 pass) MXU precision; use
    # Precision.HIGHEST on both sides if exact-f32 matching is mandatory.
    assert jnp.allclose(out, ref, atol=5e-3, rtol=5e-3), float(
        jnp.max(jnp.abs(out - ref)))

    print("KERNEL_OK")
</pallas_src>

<mosaic_0001>
module attributes {stable_mosaic.version = 11 : i64} {
  func.func @_mlp_kernel(%arg0: i32, %arg1: memref<8x32xf32, #tpu.memory_space<vmem>>, %arg2: memref<32x32xf32, #tpu.memory_space<vmem>>, %arg3: memref<1x32xf32, #tpu.memory_space<vmem>>, %arg4: memref<32x32xf32, #tpu.memory_space<vmem>>, %arg5: memref<1x32xf32, #tpu.memory_space<vmem>>, %arg6: memref<1x32xf32, #tpu.memory_space<vmem>>, %arg7: memref<1x32xf32, #tpu.memory_space<vmem>>, %arg8: memref<8x32xf32, #tpu.memory_space<vmem>>) attributes {dimension_semantics = [#tpu.dimension_semantics<parallel>], iteration_bounds = array<i64: 2>, scalar_prefetch = 0 : i64, scratch_operands = 0 : i64, tpu.core_type = #tpu.core_type<tc>, window_params = [{transform_indices = @transform_0, window_bounds = array<i64: 8, 32>}, {pipeline_mode = #tpu.pipeline_mode<synchronous>, transform_indices = @transform_1, window_bounds = array<i64: 32, 32>}, {pipeline_mode = #tpu.pipeline_mode<synchronous>, transform_indices = @transform_2, window_bounds = array<i64: 1, 32>}, {pipeline_mode = #tpu.pipeline_mode<synchronous>, transform_indices = @transform_3, window_bounds = array<i64: 32, 32>}, {pipeline_mode = #tpu.pipeline_mode<synchronous>, transform_indices = @transform_4, window_bounds = array<i64: 1, 32>}, {pipeline_mode = #tpu.pipeline_mode<synchronous>, transform_indices = @transform_5, window_bounds = array<i64: 1, 32>}, {pipeline_mode = #tpu.pipeline_mode<synchronous>, transform_indices = @transform_6, window_bounds = array<i64: 1, 32>}, {transform_indices = @transform_7, window_bounds = array<i64: 8, 32>}]} {
    %c0 = arith.constant 0 : index
    %c0_0 = arith.constant 0 : index
    %0 = vector.load %arg1[%c0, %c0_0] : memref<8x32xf32, #tpu.memory_space<vmem>>, vector<8x32xf32>
    %cst = arith.constant dense<0.000000e+00> : vector<8xf32>
    %1 = vector.multi_reduction <add>, %0, %cst [1] : vector<8x32xf32> to vector<8xf32>
    %2 = vector.shape_cast %1 : vector<8xf32> to vector<8x1xf32>
    %cst_1 = arith.constant 3.200000e+01 : f32
    %3 = vector.broadcast %cst_1 : f32 to vector<8x1xf32>
    %4 = arith.divf %2, %3 : vector<8x1xf32>
    %5 = vector.broadcast %4 : vector<8x1xf32> to vector<8x32xf32>
    %6 = arith.subf %0, %5 : vector<8x32xf32>
    %7 = arith.mulf %6, %6 : vector<8x32xf32>
    %cst_2 = arith.constant dense<0.000000e+00> : vector<8xf32>
    %8 = vector.multi_reduction <add>, %7, %cst_2 [1] : vector<8x32xf32> to vector<8xf32>
    %9 = vector.shape_cast %8 : vector<8xf32> to vector<8x1xf32>
    %cst_3 = arith.constant 3.200000e+01 : f32
    %10 = vector.broadcast %cst_3 : f32 to vector<8x1xf32>
    %11 = arith.divf %9, %10 : vector<8x1xf32>
    %cst_4 = arith.constant 9.99999974E-6 : f32
    %12 = vector.broadcast %cst_4 : f32 to vector<8x1xf32>
    %13 = arith.addf %11, %12 : vector<8x1xf32>
    %14 = math.rsqrt %13 : vector<8x1xf32>
    %15 = vector.broadcast %14 : vector<8x1xf32> to vector<8x32xf32>
    %16 = arith.mulf %6, %15 : vector<8x32xf32>
    %c0_5 = arith.constant 0 : index
    %c0_6 = arith.constant 0 : index
    %17 = vector.load %arg6[%c0_5, %c0_6] : memref<1x32xf32, #tpu.memory_space<vmem>>, vector<1x32xf32>
    %18 = vector.broadcast %17 : vector<1x32xf32> to vector<8x32xf32>
    %19 = arith.mulf %16, %18 : vector<8x32xf32>
    %c0_7 = arith.constant 0 : index
    %c0_8 = arith.constant 0 : index
    %20 = vector.load %arg7[%c0_7, %c0_8] : memref<1x32xf32, #tpu.memory_space<vmem>>, vector<1x32xf32>
    %21 = vector.broadcast %20 : vector<1x32xf32> to vector<8x32xf32>
    %22 = arith.addf %19, %21 : vector<8x32xf32>
    %c0_9 = arith.constant 0 : index
    %c0_10 = arith.constant 0 : index
    %23 = vector.load %arg2[%c0_9, %c0_10] : memref<32x32xf32, #tpu.memory_space<vmem>>, vector<32x32xf32>
    %cst_11 = arith.constant dense<0.000000e+00> : vector<8x32xf32>
    %24 = tpu.matmul %22, %23, %cst_11 {dimension_numbers = #tpu.dot_dimension_numbers<[1], [0], [0], [1], [0, 0, 1, 1], [], []>} : vector<8x32xf32>, vector<32x32xf32>, vector<8x32xf32> -> vector<8x32xf32>
    %c0_12 = arith.constant 0 : index
    %c0_13 = arith.constant 0 : index
    %25 = vector.load %arg3[%c0_12, %c0_13] : memref<1x32xf32, #tpu.memory_space<vmem>>, vector<1x32xf32>
    %26 = vector.broadcast %25 : vector<1x32xf32> to vector<8x32xf32>
    %27 = arith.addf %24, %26 : vector<8x32xf32>
    %cst_14 = arith.constant 5.000000e-01 : f32
    %28 = vector.broadcast %cst_14 : f32 to vector<8x32xf32>
    %29 = arith.mulf %28, %27 : vector<8x32xf32>
    %cst_15 = arith.constant 0.707106769 : f32
    %30 = vector.broadcast %cst_15 : f32 to vector<8x32xf32>
    %31 = arith.mulf %27, %30 : vector<8x32xf32>
    %32 = math.erf %31 : vector<8x32xf32>
    %cst_16 = arith.constant 1.000000e+00 : f32
    %33 = vector.broadcast %cst_16 : f32 to vector<8x32xf32>
    %34 = arith.addf %33, %32 : vector<8x32xf32>
    %35 = arith.mulf %29, %34 : vector<8x32xf32>
    %c0_17 = arith.constant 0 : index
    %c0_18 = arith.constant 0 : index
    %36 = vector.load %arg4[%c0_17, %c0_18] : memref<32x32xf32, #tpu.memory_space<vmem>>, vector<32x32xf32>
    %cst_19 = arith.constant dense<0.000000e+00> : vector<8x32xf32>
    %37 = tpu.matmul %35, %36, %cst_19 {dimension_numbers = #tpu.dot_dimension_numbers<[1], [0], [0], [1], [0, 0, 1, 1], [], []>} : vector<8x32xf32>, vector<32x32xf32>, vector<8x32xf32> -> vector<8x32xf32>
    %c0_20 = arith.constant 0 : index
    %c0_21 = arith.constant 0 : index
    %38 = vector.load %arg5[%c0_20, %c0_21] : memref<1x32xf32, #tpu.memory_space<vmem>>, vector<1x32xf32>
    %39 = vector.broadcast %38 : vector<1x32xf32> to vector<8x32xf32>
    %40 = arith.addf %37, %39 : vector<8x32xf32>
    %c0_22 = arith.constant 0 : index
    %c0_23 = arith.constant 0 : index
    %41 = vector.load %arg8[%c0_22, %c0_23] : memref<8x32xf32, #tpu.memory_space<vmem>>, vector<8x32xf32>
    tpu.vector_store %arg8[%c0_22, %c0_23], %40 {strides = array<i32>} : memref<8x32xf32, #tpu.memory_space<vmem>>, vector<8x32xf32>,
    return
  }
  func.func @transform_0(%arg0: i32) -> (i32, i32) {
    %c0_i32 = arith.constant 0 : i32
    %c0_i32_0 = arith.constant 0 : i32
    return %arg0, %c0_i32 : i32, i32
  }
  func.func @transform_1(%arg0: i32) -> (i32, i32) {
    %c0_i32 = arith.constant 0 : i32
    %c0_i32_0 = arith.constant 0 : i32
    %c0_i32_1 = arith.constant 0 : i32
    return %c0_i32, %c0_i32_0 : i32, i32
  }
  func.func @transform_2(%arg0: i32) -> (i32, i32) {
    %c0_i32 = arith.constant 0 : i32
    %c0_i32_0 = arith.constant 0 : i32
    %c0_i32_1 = arith.constant 0 : i32
    return %c0_i32, %c0_i32_0 : i32, i32
  }
  func.func @transform_3(%arg0: i32) -> (i32, i32) {
    %c0_i32 = arith.constant 0 : i32
    %c0_i32_0 = arith.constant 0 : i32
    %c0_i32_1 = arith.constant 0 : i32
    return %c0_i32, %c0_i32_0 : i32, i32
  }
  func.func @transform_4(%arg0: i32) -> (i32, i32) {
    %c0_i32 = arith.constant 0 : i32
    %c0_i32_0 = arith.constant 0 : i32
    %c0_i32_1 = arith.constant 0 : i32
    return %c0_i32, %c0_i32_0 : i32, i32
  }
  func.func @transform_5(%arg0: i32) -> (i32, i32) {
    %c0_i32 = arith.constant 0 : i32
    %c0_i32_0 = arith.constant 0 : i32
    %c0_i32_1 = arith.constant 0 : i32
    return %c0_i32, %c0_i32_0 : i32, i32
  }
  func.func @transform_6(%arg0: i32) -> (i32, i32) {
    %c0_i32 = arith.constant 0 : i32
    %c0_i32_0 = arith.constant 0 : i32
    %c0_i32_1 = arith.constant 0 : i32
    return %c0_i32, %c0_i32_0 : i32, i32
  }
  func.func @transform_7(%arg0: i32) -> (i32, i32) {
    %c0_i32 = arith.constant 0 : i32
    %c0_i32_0 = arith.constant 0 : i32
    return %arg0, %c0_i32 : i32, i32
  }
}

</mosaic_0001>

<bundles_post_ra>
// kernel: tpu_custom_call.1
= control target key start
LH: loop header
LB: loop body
LE: loop exit
PB: predicated region body
PF: predicated region fallthrough
CT: control target
= control target key end

     0   :  { %12 = vsyncpa [#allocation3], 0  ;;  %s1231_s0 = inlined_call_operand.hbm [shape: f32[16,32], index: 0, kind: input, shape index: {}]   ;;  %s1232_s1 = inlined_call_operand.hbm [shape: f32[32,32], index: 1, kind: input, shape index: {}]   ;;  %s1233_s2 = inlined_call_operand.vmem [shape: f32[1,32], index: 2, kind: input, shape index: {}]   ;;  %s1234_s3 = inlined_call_operand.hbm [shape: f32[32,32], index: 3, kind: input, shape index: {}]   ;;  %s1235_s4 = inlined_call_operand.vmem [shape: f32[1,32], index: 4, kind: input, shape index: {}]   ;;  %s1236_s5 = inlined_call_operand.vmem [shape: f32[1,32], index: 5, kind: input, shape index: {}]   ;;  %s1237_s6 = inlined_call_operand.vmem [shape: f32[1,32], index: 6, kind: input, shape index: {}]   ;;  %s1238_s7 = inlined_call_operand.hbm [shape: f32[16,32], index: 7, kind: output, shape index: {}]  }
   0x1   :  { %14 = vsyncpa [#allocation3 + $0x1], 0 }
   0x2   :  { %15 = vsyncpa [#allocation6], 0 }
   0x3   :  { %16 = vsyncpa [#allocation4], 0 }
   0x4   :  { %18 = vsyncpa [#allocation4 + $0x1], 0  ;;  %s981_s24 = smov 0   ;;  %s983_s25 = smov 0  }
   0x5   :  { %s985_s26 = smov 0   ;;  %s987_s27 = smov 0  }
   0x6 LB: > { %s1002_s28 = sadd.s32 4294967295, %s930_s27   ;;  %s632_s29 = sadd.s32 4294967294, %s930_s27   ;;  %s930_s27 = sphi %s987_s27, %s1258_s27   ;;  %s926_s26 = sphi %s985_s26, %s1257_s26   ;;  %s922_s25 = sphi %s983_s25, %s1256_s25   ;;  %s918_s24 = sphi %s981_s24, %s1255_s24  }
   0x7   : > { %p44_p0 = scmp.ne.s32.totalorder %s922_s25, %s918_s24  ;;  %p1239_p1 = scmp.eq.s32.totalorder %s1002_s28, 0 }
   0x8   : > { %p200_p3 = scmp.eq.s32.totalorder %s632_s29, 1  ;;  %p633_p5 = scmp.ge.s32.totalorder %s930_s27, 1 }
   0x9   : > { %p1011_p4 = por %p1239_p1, %p44_p0  ;;  %p207_p7 = scmp.lt.s32.totalorder %s930_s27, 3 }
   0xa   : > { %p1016_p6 = por %p200_p3, %p44_p0  ;;  %s932_s10 = smov [#allocation5]  }
   0xb   : > { %s1242_s30 = scalar_select %p1011_p4, 1, 0 }
   0xc   : > { %s1243_s8 = scalar_select %p1016_p6, 1, 0 }
   0xd   : > { %p1021_p8 = pnand %p633_p5, %p207_p7  ;;  %s219_s11 = sshll.u32 %s932_s10, 4  ;;  %s1025_s11 = int_to_ptr.vmem [resolvable:$true] %s219_s11 }
   0xe   : > { %s933_s13 = smov [#allocation7]   ;;  %s774_s17 = scalar_lea.hbm %s1232_s1, 512 }
   0xf   : > { %p710_p9 = pneg %p1021_p8  ;;  %s235_s14 = sshll.u32 %s933_s13, 4  ;;  %s1036_s14 = int_to_ptr.vmem [resolvable:$true] %s235_s14 }
  0x10   : > { %p775_p12 = scmp.ne.s32.totalorder %s1232_s1, %s774_s17  ;;  %p781_p5 = scmp.lt.u32.totalorder %s774_s17, %s1232_s1 }
  0x11   : > { %p1032_p11 = pnand %p710_p9, %p1239_p1 }
  0x13   : > { %p776_p13 = pneg %p1032_p11 }
  0x15   : > { %p777_p0 = pnand %p776_p13, %p775_p12 }
  0x17   : > { %p778_p3 = pneg %p777_p0 }
  0x19   : > { %p783_p7 = pnand %p781_p5, %p778_p3 }
  0x1b   : > { %786 = shalt.err (!%p783_p7)
}
  0x1c   : > { %s787_s22 = scalar_lea.vmem %s1025_s11, 512  ;;  %p795_p2 = scmp.lt.s32.totalorder %s1025_s11, %s1025_s11 }
  0x1d   : > { %p788_p9 = scmp.ne.s32.totalorder %s1025_s11, %s787_s22  ;;  %p796_p12 = scmp.lt.s32.totalorder %s787_s22, %s787_s22 }
  0x1f   : > { %p790_p10 = pnand %p788_p9, %p776_p13  ;;  %p797_p0 = por %p796_p12, %p795_p2 }
  0x21   : > { %p791_p1 = pneg %p790_p10 }
  0x23   : > { %p798_p6 = pnand %p797_p0, %p791_p1 }
  0x25   : > { %801 = shalt.err (!%p798_p6)
}
  0x26   : > { %s934_s23 = smov 128   ;;  %s935_s29 = smov 8  }
  0x27   : > { %713 = dma.hbm_to_vmem [thread:$0]  (!%p1032_p11), %s1232_s1, 512, %s1025_s11, [#allocation6], %s934_s23, %s934_s23, %s935_s29  }
  0x28   : > { %s802_s17 = scalar_lea.hbm %s1234_s3, 512 }
  0x29   : > { %p803_p2 = scmp.ne.s32.totalorder %s1234_s3, %s802_s17  ;;  %p809_p10 = scmp.lt.u32.totalorder %s802_s17, %s1234_s3 }
  0x2b   : > { %p805_p1 = pnand %p803_p2, %p776_p13 }
  0x2d   : > { %p806_p6 = pneg %p805_p1 }
  0x2f   : > { %p811_p3 = pnand %p809_p10, %p806_p6 }
  0x31   : > { %814 = shalt.err (!%p811_p3)
}
  0x32   : > { %s815_s11 = scalar_lea.vmem %s1036_s14, 512  ;;  %p823_p12 = scmp.lt.s32.totalorder %s1036_s14, %s1036_s14 }
  0x33   : > { %p816_p5 = scmp.ne.s32.totalorder %s1036_s14, %s815_s11  ;;  %p824_p0 = scmp.lt.s32.totalorder %s815_s11, %s815_s11 }
  0x35   : > { %p818_p7 = pnand %p816_p5, %p776_p13  ;;  %p825_p2 = por %p824_p0, %p823_p12 }
  0x37   : > { %p819_p9 = pneg %p818_p7 }
  0x39   : > { %p826_p1 = pnand %p825_p2, %p819_p9 }
  0x3b   : > { %829 = shalt.err (!%p826_p1)
}
  0x3c   : > { %716 = dma.hbm_to_vmem [thread:$0]  (!%p1032_p11), %s1234_s3, 512, %s1036_s14, [#allocation6], %s934_s23, %s934_s23, %s935_s29  }
  0x3d   : > { %s1091_s13 = sadd.s32 1, %s930_s27   ;;  %s31_s12 = sadd.s32 1, %s926_s26 }
  0x3e   : > { %s28_s15 = ssub.s32 %s930_s27, %s1091_s13  ;;  %p38_p13 = scmp.ne.s32.totalorder %s926_s26, %s922_s25 }
  0x3f   : > { %p29_p6 = scmp.eq.s32.totalorder %s28_s15, 0  ;;  %p39_p10 = scmp.eq.s32.totalorder %s930_s27, 0 }
  0x40   : > { %p1246_p3 = scmp.eq.s32.totalorder %s1002_s28, 1  ;;  %p727_p7 = scmp.lt.s32.totalorder %s930_s27, 2 }
  0x41   : > { %s1107_s17 = scalar_select %p29_p6, %s926_s26, %s31_s12  }
  0x42   : > { %p1101_p5 = por %p1246_p3, %p38_p13  ;;  %p40_p9 = por %p39_p10, %p38_p13 }
  0x43   : > { %s258_s18 = sand.u32 1, %s926_s26   ;;  %s638_s14 = sshll.u32 %s930_s27, 7 }
  0x44   : > { %s1247_s16 = scalar_select %p1101_p5, 1, 0 }
  0x45   : > { %s637_s19 = sshll.u32 %s258_s18, 3  ;;  %s1114_s20 = scalar_lea.hbm %s1231_s0, %s638_s14 }
  0x46   : > { %s262_s21 = scalar_lea.vmem [#allocation2], %s637_s19  ;;  %p1118_p11 = pnand %p727_p7, %p40_p9 }
  0x47   : > { %s269_s11 = sshll.u32 %s262_s21, 4  ;;  %s259_s10 = scalar_lea.sflag [#allocation3], %s258_s18  ;;  %s1116_s11 = int_to_ptr.vmem [resolvable:$true] %s269_s11 }
  0x48   : > { %s830_s12 = scalar_lea.hbm %s1114_s20, 128  ;;  %p832_p0 = pneg %p1118_p11 }
  0x49   : > { %p831_p12 = scmp.ne.s32.totalorder %s1114_s20, %s830_s12  ;;  %s835_s14 = scalar_lea.hbm %s1231_s0, 256 }
  0x4a   : > { %p836_p13 = scmp.lt.u32.totalorder %s1114_s20, %s1231_s0  ;;  %p837_p6 = scmp.lt.u32.totalorder %s835_s14, %s830_s12 }
  0x4b   : > { %p833_p2 = pnand %p832_p0, %p831_p12  ;;  %p839_p3 = scmp.lt.u32.totalorder %s830_s12, %s1114_s20 }
  0x4c   : > { %p838_p10 = por %p837_p6, %p836_p13 }
  0x4d   : > { %p834_p1 = pneg %p833_p2 }
  0x4e   : > { %p840_p7 = por %p839_p3, %p838_p10 }
  0x50   : > { %p841_p9 = pnand %p840_p7, %p834_p1 }
  0x52   : > { %844 = shalt.err (!%p841_p9)
}
  0x53   : > { %s845_s18 = scalar_lea.vmem %s1116_s11, 128  ;;  %s936_s21 = smov [#allocation2]  }
  0x54   : > { %p846_p12 = scmp.ne.s32.totalorder %s1116_s11, %s845_s18  ;;  %s850_s15 = sshll.u32 %s936_s21, 4  ;;  %s851_s15 = int_to_ptr.vmem [resolvable:$false] %s850_s15 }
  0x55   : > { %s852_s19 = scalar_lea.vmem %s851_s15, 256  ;;  %p853_p4 = scmp.lt.s32.totalorder %s1116_s11, %s851_s15 }
  0x56   : > { %p848_p2 = pnand %p846_p12, %p832_p0  ;;  %p854_p13 = scmp.lt.s32.totalorder %s852_s19, %s845_s18 }
  0x58   : > { %p849_p5 = pneg %p848_p2  ;;  %p855_p6 = por %p854_p13, %p853_p4 }
  0x5a   : > { %p856_p10 = pnand %p855_p6, %p849_p5 }
  0x5c   : > { %859 = shalt.err (!%p856_p10)
}
  0x5d   : > { %720 = dma.hbm_to_vmem [thread:$0]  (!%p1118_p11), %s1114_s20, 128, %s1116_s11, %s259_s10  }
  0x5e   : > { %278 = sbr.rel (%p1021_p8) target bundleno = 878 (0x36e), region = 48  ;;  %s1150_s12 = sand.u32 (!%p1021_p8), 1, %s922_s25  }
  0x5f   : > { %s640_s14 = sshll.u32 (!%p1021_p8), %s1150_s12, 3  ;;  %s281_s23 = scalar_lea.sflag (!%p1021_p8), [#allocation3], %s1150_s12 }
  0x60   : > { %s284_s29 = scalar_lea.vmem (!%p1021_p8), [#allocation2], %s640_s14  ;;  %p1249_p4 = scmp.ne.s32.totalorder (!%p1021_p8), %s1242_s30, 0 }
  0x65   : > { %905 = dma.done.wait (%p1249_p4), %s281_s23, 128  }
  0x66   : > { %907 = vsyncadd (%p1249_p4), %s281_s23, 4294967168  ;;  %p1250_p5 = scmp.eq.s32.totalorder %s1002_s28, 0 }
  0x68   : > { %909 = dma.done.wait (%p1250_p5), [#allocation6], 1024   ;;  %p1251_p8 = pmov %p1250_p5 }
  0x69   : > { %vm324_vm0 = vcmask 261120   ;;  %v323_v0 = vld [vmem:[%s284_s29] sm:$0xff]  ;;  %v355_v7 = vld [vmem:[#allocation5] sm:$0xff]  ;;  %v356_v8 = vld [vmem:[#allocation5 + $0x8] sm:$0xff]  ;;  %v937_v10 = vmov 0.0|0.0   ;;  %vm938_vm1 = vmmov 0  }
  0x6a   : > { %911 = vsyncadd (%p1251_p8), [#allocation6], 4294966272  ;;  %v325_v1 = vsel %vm324_vm0, %v323_v0, 0.0  ;;  %v357_v9 = vld [vmem:[#allocation5 + $0x10] sm:$0xff]  ;;  %686 = vmatprep.subr.bf16.mxu0 %v937_v10  ;;  %v687_v11 = vpack.c.bf16 %v356_v8, %v355_v7  ;;  %v358_v12 = vld [vmem:[#allocation5 + $0x18] sm:$0xff]  ;;  %v939_v13 = vmov 0.0   ;;  %692 = vmatprep.subr.bf16.mxu1 %v937_v10 }
  0x6b   : > { %326 = vadd.xlane.f32.xlu0 %v325_v1  ;;  %672 = vmatprep.mubr.msk.f32.mxu0 %vm938_vm1, %v939_v13  ;;  %v690_v14 = vpack.c.bf16 %v358_v12, %v357_v9  ;;  %v644_v19 = vld [vmem:[%s1236_s5] ss:$0 sm:$0xff]  ;;  %v444_v24 = vld [vmem:[#allocation7] sm:$0xff]  ;;  %v445_v25 = vld [vmem:[#allocation7 + $0x8] sm:$0xff]  ;;  %s651_s15 = sshll.u32 %s1002_s28, 7  ;;  %s322_s19 = scalar_lea.vmem [#allocation8], %s640_s14 }
  0x6c   : > { %683 = vmatprep.mubr.msk.f32.mxu1 %vm938_vm1, %v939_v13  ;;  %688 = vmatpush3.bf16.msra.mxu0 %v687_v11  ;;  %v645_v21 = vld [vmem:[%s1237_s6] ss:$0 sm:$0xff]  ;;  %v693_v26 = vpack.c.bf16 %v445_v25, %v444_v24  ;;  %v447_v28 = vld [vmem:[#allocation7 + $0x18] sm:$0xff]  ;;  %s543_s23 = sshll.u32 %s322_s19, 4  ;;  %s1186_s9 = scalar_lea.hbm %s1238_s7, %s651_s15  ;;  %s1188_s23 = int_to_ptr.vmem [resolvable:$true] %s543_s23 }
  0x6d   : > { %689 = vmatprep.subr.bf16.mxu0 %v937_v10  ;;  %v446_v27 = vld [vmem:[#allocation7 + $0x10] sm:$0xff]  ;;  %s530_s20 = scalar_lea.sflag [#allocation4], %s1150_s12  ;;  %s860_s28 = scalar_lea.vmem %s1188_s23, 128 }
  0x6e   : > { %694 = vmatpush3.bf16.msra.mxu1 %v693_v26  ;;  %v696_v29 = vpack.c.bf16 %v447_v28, %v446_v27  ;;  %v646_v30 = vld [vmem:[%s1233_s2] ss:$0 sm:$0xff]  ;;  %p861_p11 = scmp.ne.s32.totalorder %s1188_s23, %s860_s28  ;;  %p1252_p0 = scmp.ne.s32.totalorder %s1247_s16, 0 }
  0x6f   : > { %695 = vmatprep.subr.bf16.mxu1 %v937_v10  ;;  %v648_v39 = vld [vmem:[%s1235_s4] ss:$0 sm:$0xff]  ;;  %s940_s14 = smov [#allocation8]  }
  0x70   : > { %691 = vmatpush3.bf16.msra.mxu0 %v690_v14  ;;  %p862_p1 = pnand %p861_p11, %p1252_p0  ;;  %s864_s11 = sshll.u32 %s940_s14, 4  ;;  %s865_s11 = int_to_ptr.vmem [resolvable:$false] %s864_s11 }
  0x71   : > { %s866_s22 = scalar_lea.vmem %s865_s11, 256  ;;  %p867_p7 = scmp.lt.s32.totalorder %s1188_s23, %s865_s11 }
  0x72   : > { %697 = vmatpush3.bf16.msra.mxu1 %v696_v29  ;;  %p863_p3 = pneg %p862_p1  ;;  %p868_p9 = scmp.lt.s32.totalorder %s866_s22, %s860_s28 }
  0x74   : > { %p869_p12 = por %p868_p9, %p867_p7 }
  0x76   : > { %p870_p2 = pnand %p869_p12, %p863_p3 }
  0xf8   : > { %v327_v2 = vpop.xlane.xlu0 %326 }
  0xf9   : > { %v329_v3 = vmul.f32 0.03125, %v327_v2 }
  0xfb   : > { %v330_v4 = vsub.f32 %v323_v0, %v329_v3 }
  0xfd   : > { %v331_v5 = vmul.f32 %v330_v4, %v330_v4 }
  0xff   : > { %v332_v6 = vsel %vm324_vm0, %v331_v5, 0.0 }
 0x100   : > { %333 = vadd.xlane.f32.xlu0 %v332_v6 }
 0x18d   : > { %v334_v15 = vpop.xlane.xlu0 %333 }
 0x18e   : > { %v335_v16 = vmul.f32 0.03125, %v334_v15 }
 0x190   : > { %v336_v17 = vadd.f32 1e-05, %v335_v16 }
 0x192   : > { %770 = vrsqrt.f32 %v336_v17 }
 0x19c   : > { %v771_v18 = vpop.eup %770 }
 0x19d   : > { %v338_v20 = vmul.f32 %v771_v18, %v330_v4 }
 0x19f   : > { %v346_v22 = vmul.f32 %v644_v19, %v338_v20 }
 0x1a1   : > { %v354_v23 = vadd.f32 %v645_v21, %v346_v22 }
 0x1a3   : > { %673 = vmatmul.mubr.msk.f32.vlgmr.msra.gmra.mrb[0].mxu0 %vm324_vm0, %v354_v23 }
 0x276   : > { %v435_v31 = vpop.f32.mrb[0].mxu0 }
 0x277   : > { %v436_v32 = vadd.f32 %v646_v30, %v435_v31  ;;  %v674_v33 = vpop.f32.mrb[1].mxu0 }
 0x279   : > { %v440_v34 = vmul.f32 0.70710677, %v436_v32  ;;  %v439_v36 = vmul.f32 0.5, %v436_v32 }
 0x27b   : > { %772 = verf.f32 %v440_v34 }
 0x285   : > { %v773_v35 = vpop.eup %772 }
 0x286   : > { %v442_v37 = vadd.f32 1.0, %v773_v35 }
 0x288   : > { %v443_v38 = vmul.f32 %v442_v37, %v439_v36 }
 0x28a   : > { %684 = vmatmul.mubr.msk.f32.vlgmr.msra.gmra.mrb[0].mxu1 %vm324_vm0, %v443_v38 }
 0x35d   : > { %v524_v40 = vpop.f32.mrb[0].mxu1 }
 0x35e   : > { %v525_v41 = vadd.f32 %v648_v39, %v524_v40  ;;  %v685_v42 = vpop.f32.mrb[1].mxu1 }
 0x360   : > { %528 = vst.msk [vmem:[%s322_s19] sm:$0xff] %vm324_vm0, %v525_v41 }
 0x361   : > { %873 = shalt.err (!%p870_p2)
}
 0x362   : > { %s874_s12 = scalar_lea.hbm %s1186_s9, 128  ;;  %s878_s21 = scalar_lea.hbm %s1238_s7, 256 }
 0x363   : > { %p875_p13 = scmp.ne.s32.totalorder %s1186_s9, %s874_s12  ;;  %p879_p4 = scmp.lt.u32.totalorder %s1186_s9, %s1238_s7 }
 0x364   : > { %p880_p5 = scmp.lt.u32.totalorder %s878_s21, %s874_s12  ;;  %p882_p11 = scmp.lt.u32.totalorder %s874_s12, %s1186_s9 }
 0x365   : > { %p876_p6 = pnand %p875_p13, %p1252_p0 }
 0x366   : > { %p881_p8 = por %p880_p5, %p879_p4 }
 0x367   : > { %p877_p10 = pneg %p876_p6 }
 0x368   : > { %p883_p1 = por %p882_p11, %p881_p8 }
 0x36a   : > { %p884_p3 = pnand %p883_p1, %p877_p10 }
 0x36c   : > { %887 = shalt.err (!%p884_p3)
}
 0x36d   : > { %708 = dma.vmem_to_hbm [thread:$0]  (%p1252_p0), %s1188_s23, 128, %s1186_s9, %s530_s20  }
 0x36e PF: > { %s555_s29 = sand.u32 1, %s918_s24   ;;  %p1253_p7 = scmp.ne.s32.totalorder %s1243_s8, 0 }
 0x36f   : > { %p1254_p9 = scmp.ge.s32.totalorder %s930_s27, 2  ;;  %s556_s30 = scalar_lea.sflag [#allocation4], %s555_s29 }
 0x371   : > { %p722_p12 = pnand %p1254_p9, %p1253_p7 }
 0x373   : > { %913 = dma.done.wait (!%p722_p12), %s556_s30, 128  }
 0x374   : > { %915 = vsyncadd (!%p722_p12), %s556_s30, 4294967168  ;;  %p21_p2 = scmp.ge.s32.totalorder %s1091_s13, 4   ;;  %s1255_s24 = smov %s922_s25 }
 0x375   : > { %s1256_s25 = smov %s926_s26  ;;  %s1257_s26 = smov %s1107_s17 }
 0x376   : > { %s1258_s27 = smov %s1091_s13  ;;  %23 = sbr.rel (!%p21_p2) target bundleno = 6 (0x6), region = 101 }
 0x37d   :  { %561 = vsyncpa [#allocation3], 1 }
 0x37e   :  { %563 = vsyncpa [#allocation3 + $0x1], 1 }
 0x37f   :  { %564 = vsyncpa [#allocation6], 1 }
 0x380   :  { %565 = vsyncpa [#allocation4], 1 }
 0x381   :  { %567 = vsyncpa [#allocation4 + $0x1], 1 }

</bundles_post_ra>
